<compile_context>
chip_gen: v7x
topology: tpu7x:2x2x1
jax: 0.10.0
libtpu: 0.0.40
codegen_flags: <defaults>
</compile_context>

<pallas_src>
import functools

import jax
import jax.numpy as jnp
from jax import lax
from jax.experimental import pallas as pl
from jax.experimental.pallas import tpu as pltpu


def _round_up(x, m):
    return ((x + m - 1) // m) * m


def _focal_loss_kernel(logits_ref, target_ref, out_ref, *, gamma):
    # (TILE_N, C) logits block; cast to f32 for stable softmax on all gens.
    x = logits_ref[...].astype(jnp.float32)                    # (T, C)
    t = target_ref[...]                                        # (T, 1) int32

    # Numerically stable log-sum-exp along the last (lane) axis.
    m = jnp.max(x, axis=-1, keepdims=True)                     # (T, 1)
    shifted = x - m                                            # (T, C)
    lse = jnp.log(jnp.sum(jnp.exp(shifted), axis=-1, keepdims=True))  # (T, 1)

    # Extract the target column via a masked row-sum (no one-hot float temp,
    # no cross-lane gather). Everything after this is (T, 1) work only.
    col_ids = lax.broadcasted_iota(jnp.int32, x.shape, dimension=1)   # (T, C)
    x_t = jnp.sum(jnp.where(col_ids == t, shifted, 0.0),
                  axis=-1, keepdims=True)                       # (T, 1)

    log_p_t = x_t - lse                                         # (T, 1)
    p_t = jnp.exp(log_p_t)                                      # (T, 1)

    one_minus_p = 1.0 - p_t
    if gamma == 2.0:
        focal_w = one_minus_p * one_minus_p
    elif gamma == 1.0:
        focal_w = one_minus_p
    elif gamma == 0.0:
        focal_w = jnp.ones_like(one_minus_p)
    else:
        focal_w = jnp.power(one_minus_p, gamma)

    out_ref[...] = -(focal_w * log_p_t)


def _auto_tile_n(c, itemsize, row_align):
    # Target ~8 MiB per logits buffer (double-buffered -> ~16 MiB of input
    # blocks), comfortably inside the scoped-VMEM budget of every generation
    # (v5e 16 MiB default raised below, v6e 32/128 MiB, v7x 32/64 MiB).
    budget = 8 * 1024 * 1024
    t = max(row_align, budget // max(1, c * itemsize))
    t = (t // row_align) * row_align
    return min(max(t, row_align), 4096)


def focal_loss(logits, targets, *, gamma=2.0, tile_n=None,
               vmem_limit_bytes=48 * 1024 * 1024):
    """Pallas TPU focal loss, reduction='none', weight=None.

    logits:  (N, C) float (f32 or bf16; bf16 is DMA'd as-is and upcast in-kernel)
    targets: (N,)   int   (assumed in [0, C); ignore_index is not handled)
    returns: (N,)   float32
    """
    # TODO(synk): PyTorch's nll_loss `weight=` / `ignore_index` paths are not
    # implemented (the module under test uses weight=None and valid targets).
    n, c = logits.shape
    targets_2d = targets.astype(jnp.int32).reshape(n, 1)

    # Sublane quantum: 8 rows for 32-bit, 16 for bf16 inputs.
    row_align = 16 if logits.dtype == jnp.bfloat16 else 8
    if tile_n is None:
        tile_n = _auto_tile_n(c, jnp.dtype(logits.dtype).itemsize, row_align)
    tile_n = max(row_align, _round_up(tile_n, row_align))
    # Never use a tile bigger than the (row-aligned) problem itself.
    tile_n = min(tile_n, _round_up(n, row_align))

    # Pad N up to a multiple of TILE_N so every grid step sees a full block.
    # Padded rows have zero logits and target 0 -> finite values, sliced off.
    n_pad = _round_up(n, tile_n)
    if n_pad != n:
        logits = jnp.pad(logits, ((0, n_pad - n), (0, 0)))
        targets_2d = jnp.pad(targets_2d, ((0, n_pad - n), (0, 0)))

    kernel = functools.partial(_focal_loss_kernel, gamma=float(gamma))

    out = pl.pallas_call(
        kernel,
        out_shape=jax.ShapeDtypeStruct((n_pad, 1), jnp.float32),
        grid=(pl.cdiv(n_pad, tile_n),),
        in_specs=[
            pl.BlockSpec((tile_n, c), lambda i: (i, 0)),   # logits row-tile
            pl.BlockSpec((tile_n, 1), lambda i: (i, 0)),   # targets row-tile
        ],
        out_specs=pl.BlockSpec((tile_n, 1), lambda i: (i, 0)),
        compiler_params=pltpu.CompilerParams(
            # Rows are independent: lets v7x shard tiles across its 2 TCs;
            # measured-neutral on single-TC v5e/v6e.
            dimension_semantics=("parallel",),
            vmem_limit_bytes=vmem_limit_bytes,
        ),
    )(logits, targets_2d)

    return out[:n, 0]


def _focal_loss_ref(logits, targets, gamma=2.0):
    # Pure-JAX reference for sanity checking.
    log_prob = jax.nn.log_softmax(logits.astype(jnp.float32), axis=-1)
    prob = jnp.exp(log_prob)
    mod = (1.0 - prob) ** gamma * log_prob
    return -jnp.take_along_axis(mod, targets[:, None].astype(jnp.int32), axis=-1)[:, 0]


if __name__ == "__main__":
    key = jax.random.PRNGKey(0)
    k1, k2, k3, k4 = jax.random.split(key, 4)

    # Small case: single grid step.
    N, C = 8, 32
    logits = jax.random.normal(k1, (N, C), dtype=jnp.float32)
    targets = jax.random.randint(k2, (N,), 0, C, dtype=jnp.int32)

    loss = jax.block_until_ready(focal_loss(logits, targets, gamma=2.0))
    ref = _focal_loss_ref(logits, targets, gamma=2.0)
    assert loss.shape == (N,)
    assert jnp.allclose(loss, ref, atol=1e-5, rtol=1e-5), (loss, ref)

    # Ragged case: N not a multiple of the tile -> exercises padding and a
    # multi-step "parallel" row grid.
    N2, C2 = 37, 128
    logits2 = jax.random.normal(k3, (N2, C2), dtype=jnp.float32)
    targets2 = jax.random.randint(k4, (N2,), 0, C2, dtype=jnp.int32)

    loss2 = jax.block_until_ready(focal_loss(logits2, targets2, gamma=2.0, tile_n=16))
    ref2 = _focal_loss_ref(logits2, targets2, gamma=2.0)
    assert loss2.shape == (N2,)
    assert jnp.allclose(loss2, ref2, atol=1e-5, rtol=1e-5), (loss2, ref2)

    print("KERNEL_OK")
</pallas_src>

<mosaic_0001>
module attributes {stable_mosaic.version = 11 : i64} {
  func.func @_focal_loss_kernel(%arg0: i32, %arg1: memref<8x32xf32, #tpu.memory_space<vmem>>, %arg2: memref<8x1xi32, #tpu.memory_space<vmem>>, %arg3: memref<8x1xf32, #tpu.memory_space<vmem>>) attributes {dimension_semantics = [#tpu.dimension_semantics<parallel>], iteration_bounds = array<i64: 1>, scalar_prefetch = 0 : i64, scratch_operands = 0 : i64, tpu.core_type = #tpu.core_type<tc>, window_params = [{transform_indices = @transform_0, window_bounds = array<i64: 8, 32>}, {transform_indices = @transform_1, window_bounds = array<i64: 8, 1>}, {transform_indices = @transform_2, window_bounds = array<i64: 8, 1>}]} {
    %c0 = arith.constant 0 : index
    %c0_0 = arith.constant 0 : index
    %0 = vector.load %arg1[%c0, %c0_0] : memref<8x32xf32, #tpu.memory_space<vmem>>, vector<8x32xf32>
    %c0_1 = arith.constant 0 : index
    %c0_2 = arith.constant 0 : index
    %1 = vector.load %arg2[%c0_1, %c0_2] : memref<8x1xi32, #tpu.memory_space<vmem>>, vector<8x1xi32>
    %cst = arith.constant dense<0xFF800000> : vector<8xf32>
    %2 = vector.multi_reduction <maximumf>, %0, %cst [1] : vector<8x32xf32> to vector<8xf32>
    %3 = vector.shape_cast %2 : vector<8xf32> to vector<8x1xf32>
    %4 = vector.broadcast %3 : vector<8x1xf32> to vector<8x32xf32>
    %5 = arith.subf %0, %4 : vector<8x32xf32>
    %6 = math.exp %5 : vector<8x32xf32>
    %cst_3 = arith.constant dense<0.000000e+00> : vector<8xf32>
    %7 = vector.multi_reduction <add>, %6, %cst_3 [1] : vector<8x32xf32> to vector<8xf32>
    %8 = vector.shape_cast %7 : vector<8xf32> to vector<8x1xf32>
    %9 = math.log %8 : vector<8x1xf32>
    %10 = tpu.iota {dimensions = array<i32: 1>} : vector<8x32xi32>
    %11 = vector.broadcast %1 : vector<8x1xi32> to vector<8x32xi32>
    %12 = arith.cmpi eq, %10, %11 : vector<8x32xi32>
    %cst_4 = arith.constant 0.000000e+00 : f32
    %13 = vector.broadcast %cst_4 : f32 to vector<8x32xf32>
    %14 = arith.select %12, %5, %13 : vector<8x32xi1>, vector<8x32xf32>
    %cst_5 = arith.constant dense<0.000000e+00> : vector<8xf32>
    %15 = vector.multi_reduction <add>, %14, %cst_5 [1] : vector<8x32xf32> to vector<8xf32>
    %16 = vector.shape_cast %15 : vector<8xf32> to vector<8x1xf32>
    %17 = arith.subf %16, %9 : vector<8x1xf32>
    %18 = math.exp %17 : vector<8x1xf32>
    %cst_6 = arith.constant 1.000000e+00 : f32
    %19 = vector.broadcast %cst_6 : f32 to vector<8x1xf32>
    %20 = arith.subf %19, %18 : vector<8x1xf32>
    %21 = arith.mulf %20, %20 : vector<8x1xf32>
    %22 = arith.mulf %21, %17 : vector<8x1xf32>
    %cst_7 = arith.constant 0.000000e+00 : f32
    %23 = vector.broadcast %cst_7 : f32 to vector<8x1xf32>
    %24 = arith.subf %23, %22 : vector<8x1xf32>
    %c0_8 = arith.constant 0 : index
    %c0_9 = arith.constant 0 : index
    %25 = vector.load %arg3[%c0_8, %c0_9] : memref<8x1xf32, #tpu.memory_space<vmem>>, vector<8x1xf32>
    tpu.vector_store %arg3[%c0_8, %c0_9], %24 {strides = array<i32>} : memref<8x1xf32, #tpu.memory_space<vmem>>, vector<8x1xf32>,
    return
  }
  func.func @transform_0(%arg0: i32) -> (i32, i32) {
    %c0_i32 = arith.constant 0 : i32
    %c0_i32_0 = arith.constant 0 : i32
    return %arg0, %c0_i32 : i32, i32
  }
  func.func @transform_1(%arg0: i32) -> (i32, i32) {
    %c0_i32 = arith.constant 0 : i32
    %c0_i32_0 = arith.constant 0 : i32
    return %arg0, %c0_i32 : i32, i32
  }
  func.func @transform_2(%arg0: i32) -> (i32, i32) {
    %c0_i32 = arith.constant 0 : i32
    %c0_i32_0 = arith.constant 0 : i32
    return %arg0, %c0_i32 : i32, i32
  }
}

</mosaic_0001>

<bundles_post_ra>
// kernel: tpu_custom_call.1
= control target key start
LH: loop header
LB: loop body
LE: loop exit
PB: predicated region body
PF: predicated region fallthrough
CT: control target
= control target key end

     0   :  { %vm13_vm0 = vcmask 261120   ;;  %v56_v1 = vmov 0   ;;  %v25_v7 = vlaneseq  ;;  %vm42_vm2 = vcmask 7168   ;;  %s84_s0 = inlined_call_operand.vmem [shape: f32[8,32], index: 0, kind: input, shape index: {}]   ;;  %s85_s1 = inlined_call_operand.vmem [shape: s32[8,1], index: 1, kind: input, shape index: {}]   ;;  %s86_s2 = inlined_call_operand.vmem [shape: f32[8,1], index: 2, kind: output, shape index: {}]  }
   0x1   :  { %v11_v0 = vld [vmem:[%s84_s0] sm:$0xff]  ;;  %49 = vset.pattern.permute.xlu0 %v56_v1 }
   0x2   :  { %v14_v2 = vsel %vm13_vm0, %v11_v0, -inf  ;;  %v12_v3 = vld [vmem:[%s85_s1] sm:$0xff]  ;;  %v26_v8 = vand.u32 127, %v25_v7 }
   0x3   :  { %15 = vmax.xlane.f32.xlu0 %v14_v2 }
  0x19   :  { %28 = vperm.xlu0 %49, %v12_v3  }
  0x90   :  { %v16_v4 = vpop.xlane.xlu0 %15 }
  0x91   :  { %v17_v5 = vsub.f32 %v11_v0, %v16_v4 }
  0x93   :  { %v18_v6 = vmul.f32 1.442695, %v17_v5 }
  0x95   :  { %50 = vpow2.f32 %v18_v6 }
  0x98   :  { %v29_v9 = vpop.permute.xlu0 %28 }
  0x99   :  { %vm30_vm1 = vcmp.eq.s32.totalorder %v26_v8, %v29_v9 }
  0x9a   :  { %v31_v12 = vsel %vm30_vm1, %v17_v5, 0.0 }
  0x9b   :  { %v32_v13 = vsel %vm13_vm0, %v31_v12, 0.0 }
  0x9f   :  { %v51_v10 = vpop.eup %50 }
  0xa0   :  { %v20_v11 = vsel %vm13_vm0, %v51_v10, 0.0 }
  0xa1   :  { %21 = vadd.xlane.f32.xlu1 %v20_v11 }
  0xa5   :  { %33 = vadd.xlane.f32.xlu1 %v32_v13 }
 0x12e   :  { %v22_v14 = vpop.xlane.xlu1 %21 }
 0x12f   :  { %52 = vlog2.f32 %v22_v14 }
 0x132   :  { %v34_v17 = vpop.xlane.xlu1 %33 }
 0x139   :  { %v53_v15 = vpop.eup %52 }
 0x13a   :  { %v24_v16 = vmul.f32 0.6931472, %v53_v15 }
 0x13c   :  { %v35_v18 = vsub.f32 %v34_v17, %v24_v16 }
 0x13e   :  { %v36_v19 = vmul.f32 1.442695, %v35_v18 }
 0x140   :  { %54 = vpow2.f32 %v36_v19 }
 0x14a   :  { %v55_v20 = vpop.eup %54 }
 0x14b   :  { %v38_v21 = vsub.f32 1.0, %v55_v20 }
 0x14d   :  { %v39_v22 = vmul.f32 %v38_v21, %v38_v21 }
 0x14f   :  { %v40_v23 = vmul.f32 %v39_v22, %v35_v18 }
 0x151   :  { %v41_v24 = vsub.f32 0.0, %v40_v23 }
 0x153   :  { %43 = vst.msk [vmem:[%s86_s2] sm:$0xff] %vm42_vm2, %v41_v24 }

</bundles_post_ra>
